<compile_context>
chip_gen: v5e
topology: v5e:2x2
jax: 0.10.0
libtpu: 0.0.40
codegen_flags: <defaults>
</compile_context>

<pallas_src>
import functools

import jax
import jax.numpy as jnp
from jax.experimental import pallas as pl
from jax.experimental.pallas import tpu as pltpu

IN_FEATURES = 2
HIDDEN1 = 20
HIDDEN2 = 20
LANES = 128
SUBLANES = 8

# Packed parameter slab layout, shape (PARAM_ROWS, 128), f32, zero elsewhere:
#   rows 0..1    : w1[0, :], w1[1, :]        cols 0:HIDDEN1
#   row 2        : b1                        cols 0:HIDDEN1
#   row 3        : b2                        cols 0:HIDDEN2
#   rows 4..7    : zero padding (completes the first (8,128) tile)
#   rows 8..135  : w2 zero-padded to (128,128); row 8+i holds w2[i, :HIDDEN2]
W2_ROW0 = 8
PARAM_ROWS = W2_ROW0 + LANES  # 136


def _round_up(n, m):
    return ((n + m - 1) // m) * m


def pack_params(w1, b1, w2, b2):
    """Pack (w1:(2,H1), b1:(H1,), w2:(H1,H2), b2:(H2,)) into one padded slab.

    Correctness of the padded math relies on the slab being exactly zero
    outside the valid w1/b1/b2/w2 regions; keep that invariant.
    """
    p = jnp.zeros((PARAM_ROWS, LANES), jnp.float32)
    p = p.at[0:IN_FEATURES, :HIDDEN1].set(w1.astype(jnp.float32))
    p = p.at[2, :HIDDEN1].set(b1.astype(jnp.float32))
    p = p.at[3, :HIDDEN2].set(b2.astype(jnp.float32))
    p = p.at[W2_ROW0:W2_ROW0 + HIDDEN1, :HIDDEN2].set(w2.astype(jnp.float32))
    return p


def mlp_kernel(x_ref, p_ref, o_ref):
    x = x_ref[...]                                   # (TM, 2) f32
    w1_0 = p_ref[0:1, :]                             # (1, 128)
    w1_1 = p_ref[1:2, :]                             # (1, 128)
    b1 = p_ref[2:3, :]                               # (1, 128)
    b2 = p_ref[3:4, :]                               # (1, 128)
    # Layer 1 on the VPU: K=2 -> two broadcast FMAs.  Padded lanes (>= HIDDEN1)
    # are relu(0 + 0) = 0, so they contribute nothing to the fc2 contraction.
    # (Note: non-finite inputs would poison padded lanes via inf*0=NaN.)
    h = jnp.maximum(x[:, 0:1] * w1_0 + x[:, 1:2] * w1_1 + b1, 0.0)  # (TM, 128)
    # Layer 2 on the MXU with a zero-padded (128, 128) weight block.
    w2 = p_ref[W2_ROW0:W2_ROW0 + LANES, :]           # (128, 128)
    y = jnp.dot(h, w2, preferred_element_type=jnp.float32) + b2     # (TM, 128)
    # Store only the HIDDEN2 valid lanes: the output array is (B, HIDDEN2), so
    # HBM writeback is 80 B/row instead of 512 B/row plus a post-kernel slice.
    o_ref[...] = y[:, :HIDDEN2].astype(o_ref.dtype)


@functools.partial(jax.jit, static_argnames=("block_m", "grid_threshold"))
def mlp_forward(x, params, *, block_m=2048, grid_threshold=512):
    """y = fc2(relu(fc1(x))). x: (B, 2) f32; params: packed slab."""
    B = x.shape[0]
    if B <= grid_threshold:
        # Tiny problem (the module's nominal x.view(1, -1) case): one gridless
        # whole-array VMEM kernel; no pads, no slices, no pipeline machinery.
        return pl.pallas_call(
            mlp_kernel,
            out_shape=jax.ShapeDtypeStruct((B, HIDDEN2), jnp.float32),
            in_specs=[
                pl.BlockSpec(memory_space=pltpu.MemorySpace.VMEM),
                pl.BlockSpec(memory_space=pltpu.MemorySpace.VMEM),
            ],
            out_specs=pl.BlockSpec(memory_space=pltpu.MemorySpace.VMEM),
        )(x, params)

    # Large batch: tile the batch axis with a cdiv grid (Pallas masks the
    # overhanging tail block, so B is never padded and no garbage rows are
    # written back).  Params stay VMEM-resident (constant index_map); the
    # batch axis is "parallel" so v7x can shard blocks across its two TCs.
    bm = _round_up(min(block_m, _round_up(B, SUBLANES)), SUBLANES)
    return pl.pallas_call(
        mlp_kernel,
        out_shape=jax.ShapeDtypeStruct((B, HIDDEN2), jnp.float32),
        grid=(pl.cdiv(B, bm),),
        in_specs=[
            pl.BlockSpec((bm, IN_FEATURES), lambda i: (i, 0)),
            pl.BlockSpec((PARAM_ROWS, LANES), lambda i: (0, 0)),
        ],
        out_specs=pl.BlockSpec((bm, HIDDEN2), lambda i: (i, 0)),
        compiler_params=pltpu.CompilerParams(
            dimension_semantics=("parallel",)),
    )(x, params)


def init_linear_params(key, in_f, out_f):
    # Deterministic init mimicking nn.Linear: U(-1/sqrt(fan_in), 1/sqrt(fan_in)).
    kw, kb = jax.random.split(key)
    bound = 1.0 / jnp.sqrt(jnp.float32(in_f))
    # Stored as (in_f, out_f) == W.T relative to PyTorch's (out_f, in_f).
    w = jax.random.uniform(kw, (in_f, out_f), jnp.float32, -bound, bound)
    b = jax.random.uniform(kb, (out_f,), jnp.float32, -bound, bound)
    return w, b


if __name__ == "__main__":
    key = jax.random.PRNGKey(0)
    kx1, kx2, kx3, k1, k2, k3 = jax.random.split(key, 6)

    w1, b1 = init_linear_params(k1, IN_FEATURES, HIDDEN1)
    w2, b2 = init_linear_params(k2, HIDDEN1, HIDDEN2)
    # fc3 exists in __init__ but is unused in forward(); initialized for parity.
    w3, b3 = init_linear_params(k3, HIDDEN2, 2)

    params = pack_params(w1, b1, w2, b2)

    def ref_forward(xx):
        return jnp.maximum(xx @ w1 + b1, 0.0) @ w2 + b2

    # Nominal module shape: x.contiguous().view(1, -1) -> (1, 2).
    x1 = jax.random.normal(kx1, (1, IN_FEATURES), jnp.float32)
    out1 = mlp_forward(x1, params)
    jax.block_until_ready(out1)
    assert out1.shape == (1, HIDDEN2)
    assert jnp.allclose(out1, ref_forward(x1), atol=1e-4, rtol=1e-4)

    # Small batch -> still the gridless whole-array path.
    x8 = jax.random.normal(kx2, (8, IN_FEATURES), jnp.float32)
    out8 = mlp_forward(x8, params)
    jax.block_until_ready(out8)
    assert out8.shape == (8, HIDDEN2)
    assert jnp.allclose(out8, ref_forward(x8), atol=1e-4, rtol=1e-4)

    # Larger batch -> batch-tiled "parallel" grid path, with a non-divisible
    # tail block (1000 rows, block_m=512 -> 2 steps, masked tail).
    xb = jax.random.normal(kx3, (1000, IN_FEATURES), jnp.float32)
    outb = mlp_forward(xb, params, block_m=512, grid_threshold=256)
    jax.block_until_ready(outb)
    assert outb.shape == (1000, HIDDEN2)
    assert jnp.allclose(outb, ref_forward(xb), atol=1e-4, rtol=1e-4)

    print("KERNEL_OK")
</pallas_src>

<mosaic_0001>
module attributes {stable_mosaic.version = 11 : i64} {
  func.func @mlp_kernel(%arg0: memref<1x2xf32, #tpu.memory_space<vmem>>, %arg1: memref<136x128xf32, #tpu.memory_space<vmem>>, %arg2: memref<1x20xf32, #tpu.memory_space<vmem>>) attributes {dimension_semantics = [], scalar_prefetch = 0 : i64, scratch_operands = 0 : i64, tpu.core_type = #tpu.core_type<tc>} {
    %c0 = arith.constant 0 : index
    %c0_0 = arith.constant 0 : index
    %0 = vector.load %arg0[%c0, %c0_0] : memref<1x2xf32, #tpu.memory_space<vmem>>, vector<1x2xf32>
    %c0_1 = arith.constant 0 : index
    %c0_2 = arith.constant 0 : index
    %1 = vector.load %arg1[%c0_1, %c0_2] : memref<136x128xf32, #tpu.memory_space<vmem>>, vector<1x128xf32>
    %c1 = arith.constant 1 : index
    %c0_3 = arith.constant 0 : index
    %2 = vector.load %arg1[%c1, %c0_3] : memref<136x128xf32, #tpu.memory_space<vmem>>, vector<1x128xf32>
    %c2 = arith.constant 2 : index
    %c0_4 = arith.constant 0 : index
    %3 = vector.load %arg1[%c2, %c0_4] : memref<136x128xf32, #tpu.memory_space<vmem>>, vector<1x128xf32>
    %c3 = arith.constant 3 : index
    %c0_5 = arith.constant 0 : index
    %4 = vector.load %arg1[%c3, %c0_5] : memref<136x128xf32, #tpu.memory_space<vmem>>, vector<1x128xf32>
    %5 = vector.extract_strided_slice %0 {offsets = [0, 0], sizes = [1, 1], strides = [1, 1]} : vector<1x2xf32> to vector<1x1xf32>
    %6 = vector.broadcast %5 : vector<1x1xf32> to vector<1x128xf32>
    %7 = arith.mulf %6, %1 : vector<1x128xf32>
    %8 = vector.extract_strided_slice %0 {offsets = [0, 1], sizes = [1, 1], strides = [1, 1]} : vector<1x2xf32> to vector<1x1xf32>
    %9 = vector.broadcast %8 : vector<1x1xf32> to vector<1x128xf32>
    %10 = arith.mulf %9, %2 : vector<1x128xf32>
    %11 = arith.addf %7, %10 : vector<1x128xf32>
    %12 = arith.addf %11, %3 : vector<1x128xf32>
    %cst = arith.constant 0.000000e+00 : f32
    %13 = vector.broadcast %cst : f32 to vector<1x128xf32>
    %14 = arith.maximumf %12, %13 : vector<1x128xf32>
    %c8 = arith.constant 8 : index
    %c0_6 = arith.constant 0 : index
    %15 = vector.load %arg1[%c8, %c0_6] : memref<136x128xf32, #tpu.memory_space<vmem>>, vector<128x128xf32>
    %cst_7 = arith.constant dense<0.000000e+00> : vector<1x128xf32>
    %16 = tpu.matmul %14, %15, %cst_7 {dimension_numbers = #tpu.dot_dimension_numbers<[1], [0], [0], [1], [0, 0, 1, 1], [], []>} : vector<1x128xf32>, vector<128x128xf32>, vector<1x128xf32> -> vector<1x128xf32>
    %17 = arith.addf %16, %4 : vector<1x128xf32>
    %18 = vector.extract_strided_slice %17 {offsets = [0, 0], sizes = [1, 20], strides = [1, 1]} : vector<1x128xf32> to vector<1x20xf32>
    %c0_8 = arith.constant 0 : index
    %c0_9 = arith.constant 0 : index
    %19 = vector.load %arg2[%c0_8, %c0_9] : memref<1x20xf32, #tpu.memory_space<vmem>>, vector<1x20xf32>
    tpu.vector_store %arg2[%c0_8, %c0_9], %18 {strides = array<i32>} : memref<1x20xf32, #tpu.memory_space<vmem>>, vector<1x20xf32>,
    return
  }
}

</mosaic_0001>

<bundles_post_ra>
// kernel: mlp_forward.1
= control target key start
LH: loop header
LB: loop body
LE: loop exit
PB: predicated region body
PF: predicated region fallthrough
CT: control target
= control target key end

     0   :  { %7 = vsyncpa [#allocation3], 0  ;;  %s237_s0 = inlined_call_operand.hbm [shape: f32[1,2], index: 0, kind: input, shape index: {}]   ;;  %s238_s1 = inlined_call_operand.hbm [shape: f32[136,128], index: 1, kind: input, shape index: {}]   ;;  %s239_s2 = inlined_call_operand.hbm [shape: f32[1,20], index: 2, kind: output, shape index: {}]  }
   0x1   :  { %8 = vsyncpa [#allocation6], 0 }
   0x2   :  { %9 = vsyncpa [#allocation4], 0  ;;  %s15_s11 = sshll.u32 %s237_s0, 4  ;;  %s206_s12 = smov [#allocation2]   ;;  %s16_s11 = int_to_ptr.hbm [resolvable:$true] %s15_s11 }
   0x3   :  { %s17_s13 = sshll.u32 %s206_s12, 4  ;;  %s25_s16 = sshll.u32 %s238_s1, 4  ;;  %s18_s13 = int_to_ptr.vmem [resolvable:$true] %s17_s13  ;;  %s26_s16 = int_to_ptr.hbm [resolvable:$true] %s25_s16 }
   0x4   :  { %20 = dma.hbm_to_vmem [thread:$0]  %s16_s11, 16, %s18_s13, [#allocation3]  }
   0x5   :  { %s207_s17 = smov [#allocation5]   ;;  %s208_s19 = smov 128  }
   0x6   :  { %s27_s18 = sshll.u32 %s207_s17, 4  ;;  %s209_s20 = smov 8   ;;  %s28_s18 = int_to_ptr.vmem [resolvable:$true] %s27_s18 }
   0x7   :  { %33 = dma.hbm_to_vmem [thread:$0]  %s26_s16, 2176, %s28_s18, [#allocation6], %s208_s19, %s208_s19, %s209_s20  }
   0x8   :  { %200 = dma.done.wait [#allocation3], 16  }
   0x9   :  { %201 = vsyncadd [#allocation3], 4294967280 }
   0xa   :  { %202 = dma.done.wait [#allocation6], 2176  }
   0xb   :  { %203 = vsyncadd [#allocation6], 4294965120  ;;  %v210_v0 = vmov 0   ;;  %v42_v1 = vld [vmem:[#allocation2] sm:$0x1]  ;;  %v78_v2 = vld [vmem:[#allocation5 + $0x80] sm:$0xff] }
   0xc   :  { %126 = vset.pattern.permute.xlu0 %v210_v0  ;;  %v77_v3 = vld [vmem:[#allocation5 + $0x78] sm:$0xff]  ;;  %79 = vmatpush.msra.mxu0 %v78_v2  ;;  %v76_v4 = vld [vmem:[#allocation5 + $0x70] sm:$0xff]  ;;  %v75_v5 = vld [vmem:[#allocation5 + $0x68] sm:$0xff]  ;;  %v211_v8 = vmov 1   ;;  %s212_s0 = smov [#allocation7]   ;;  %s108_s23 = sshll.u32 %s239_s2, 4  ;;  %s109_s23 = int_to_ptr.hbm [resolvable:$true] %s108_s23 }
   0xd   :  { %49 = vperm.xlu0 %126, %v42_v1   ;;  %v74_v6 = vld [vmem:[#allocation5 + $0x60] sm:$0xff]  ;;  %v73_v7 = vld [vmem:[#allocation5 + $0x58] sm:$0xff]  ;;  %v72_v9 = vld [vmem:[#allocation5 + $0x50] sm:$0xff]  ;;  %s106_s1 = sshll.u32 %s212_s0, 4  ;;  %vm99_vm0 = vcmask 155648   ;;  %s107_s1 = int_to_ptr.vmem [resolvable:$true] %s106_s1 }
   0xe   :  { %80 = vmatpush.msra.mxu0 %v77_v3  ;;  %v71_v10 = vld [vmem:[#allocation5 + $0x48] sm:$0xff]  ;;  %v70_v11 = vld [vmem:[#allocation5 + $0x40] sm:$0xff]  ;;  %v69_v12 = vld [vmem:[#allocation5 + $0x38] sm:$0xff] }
   0xf   :  { %v68_v13 = vld [vmem:[#allocation5 + $0x30] sm:$0xff]  ;;  %v67_v14 = vld [vmem:[#allocation5 + $0x28] sm:$0xff]  ;;  %v66_v15 = vld [vmem:[#allocation5 + $0x20] sm:$0xff] }
  0x10   :  { %81 = vmatpush.msra.mxu0 %v76_v4  ;;  %v65_v16 = vld [vmem:[#allocation5 + $0x18] sm:$0xff]  ;;  %v64_v17 = vld [vmem:[#allocation5 + $0x10] sm:$0xff]  ;;  %v63_v18 = vld [vmem:[#allocation5 + $0x8] sm:$0xff] }
  0x11   :  { %v43_v21 = vld [vmem:[#allocation5] sm:$0x1]  ;;  %v44_v22 = vld [vmem:[#allocation5 + $0x1] sm:$0x1]  ;;  %v45_v27 = vld [vmem:[#allocation5 + $0x2] sm:$0x1] }
  0x12   :  { %82 = vmatpush.msra.mxu0 %v75_v5  ;;  %v46_v31 = vld [vmem:[#allocation5 + $0x3] sm:$0x1] }
  0x14   :  { %83 = vmatpush.msra.mxu0 %v74_v6 }
  0x15   :  { %127 = vset.pattern.permute.xlu0 %v211_v8 }
  0x16   :  { %55 = vperm.xlu0 %127, %v42_v1   ;;  %84 = vmatpush.msra.mxu0 %v73_v7 }
  0x18   :  { %85 = vmatpush.msra.mxu0 %v72_v9 }
  0x1a   :  { %86 = vmatpush.msra.mxu0 %v71_v10 }
  0x1c   :  { %87 = vmatpush.msra.mxu0 %v70_v11 }
  0x1e   :  { %88 = vmatpush.msra.mxu0 %v69_v12 }
  0x20   :  { %89 = vmatpush.msra.mxu0 %v68_v13 }
  0x22   :  { %90 = vmatpush.msra.mxu0 %v67_v14 }
  0x24   :  { %91 = vmatpush.msra.mxu0 %v66_v15 }
  0x26   :  { %92 = vmatpush.msra.mxu0 %v65_v16 }
  0x28   :  { %93 = vmatpush.msra.mxu0 %v64_v17 }
  0x2a   :  { %94 = vmatpush.msra.mxu0 %v63_v18 }
  0x7f   :  { %v50_v19 = vpop.permute.xlu0 %49 }
  0x80   :  { %v52_v20 = vperm.slane %v50_v19, 0 }
  0x82   :  { %v53_v25 = vmul.f32 %v52_v20, %v43_v21 }
  0x88   :  { %v56_v23 = vpop.permute.xlu0 %55 }
  0x89   :  { %v58_v24 = vperm.slane %v56_v23, 0 }
  0x8b   :  { %v59_v26 = vmul.f32 %v58_v24, %v44_v22 }
  0x8d   :  { %v60_v28 = vadd.f32 %v59_v26, %v53_v25 }
  0x8f   :  { %v61_v29 = vadd.f32 %v60_v28, %v45_v27 }
  0x91   :  { %v62_v30 = vmax.f32 %v61_v29, 0.0 }
  0x93   :  { %95 = vmatmul.f32.vlgmr.msra.gmra.mxu0 %v62_v30 }
 0x110   :  { %v96_v32 = vpop.f32.mrf.mxu0 }
 0x111   :  { %v97_v33 = vadd.f32 %v96_v32, %v46_v31 }
 0x113   :  { %100 = vst.msk [vmem:[#allocation7] sm:$0x1] %vm99_vm0, %v97_v33 }
 0x114   :  { %111 = dma.vmem_to_hbm [thread:$0]  %s107_s1, 16, %s109_s23, [#allocation4]  }
 0x115   :  { %204 = dma.done.wait [#allocation4], 16  }
 0x116   :  { %205 = vsyncadd [#allocation4], 4294967280 }
 0x117   :  { %116 = vsyncpa [#allocation3], 1 }
 0x118   :  { %117 = vsyncpa [#allocation6], 1 }
 0x119   :  { %118 = vsyncpa [#allocation4], 1 }

</bundles_post_ra>
